<compile_context>
chip_gen: v5e
topology: v5e:2x2
jax: 0.10.0
libtpu: 0.0.40
codegen_flags: <defaults>
</compile_context>

<pallas_src>
import functools
import math

import jax
import jax.numpy as jnp
from jax.experimental import pallas as pl
from jax.experimental.pallas import tpu as pltpu

LANE = 128
SUBLANE = 8


def _cheb_kernel(s_ref, w_ref, out_r_ref, out_i_ref, *, matmul_dtype=None):
    """One grid step = one row tile of the flattened (B*N) node axis.

    s_ref     : [3, TM, KDIM]  packed side inputs (KDIM = 2*K1*Cin, hop-major cols)
                  s[0] = [ Xr | Xi ]            tiled over hops         (X factor)
                  s[1] = [ Lr_sum | -Li_sum ]   repeated over Cin       (L factor, real)
                  s[2] = [ Li_sum |  Lr_sum ]   repeated over Cin       (L factor, imag)
    w_ref     : [KDIM, COUT_PAD]  hop-major packed [w_real ; w_imag]
    out_*_ref : [TM, COUT_PAD]    lane-dense real / imag outputs
    """
    xt = s_ref[0]          # [TM, KDIM]
    lfr = s_ref[1]
    lfi = s_ref[2]

    # The laplacian-rowsum * X scaling stays IN the kernel: one full-width VPU
    # multiply per output half (the wrapper only did layout, no arithmetic).
    lhs_r = lfr * xt
    lhs_i = lfi * xt

    w = w_ref[...]
    if matmul_dtype is not None:
        # v5e-safe: elementwise math stays f32; only MXU operands are narrowed.
        # (w was pre-cast once in the wrapper, not per grid step.)
        lhs_r = lhs_r.astype(matmul_dtype)
        lhs_i = lhs_i.astype(matmul_dtype)

    out_r_ref[...] = jnp.dot(lhs_r, w,
                             preferred_element_type=jnp.float32).astype(out_r_ref.dtype)
    out_i_ref[...] = jnp.dot(lhs_i, w,
                             preferred_element_type=jnp.float32).astype(out_i_ref.dtype)


def _pick_row_tile(rows, kdim, cout_pad, itemsize=4,
                   max_rows=1024, vmem_budget=24 * 1024 * 1024):
    """Largest row tile that (a) divides `rows`, (b) is sublane-aligned (or the full
    dim), (c) fits a v7x-safe VMEM budget, and (d) leaves >=2 grid steps when the
    MXU M dim is already decently filled (feeds both v7x TensorCores)."""

    def step_bytes(tm):
        s_blk = 3 * tm * kdim * itemsize          # side-input block
        o_blk = 2 * tm * cout_pad * itemsize      # two output blocks
        w_blk = kdim * cout_pad * itemsize        # packed weights
        lhs = 2 * tm * kdim * itemsize            # in-kernel LHS temporaries
        return 2 * (s_blk + o_blk + w_blk) + lhs  # double-buffered in/out

    best = rows
    for d in range(rows, 0, -1):
        if rows % d:
            continue
        if d <= max_rows and (d % SUBLANE == 0 or d == rows) \
                and step_bytes(d) <= vmem_budget:
            best = d
            break
    # Prefer >= 2 grid steps once the row tile is already MXU-sized.
    if rows // best < 2:
        for d in range(best - 1, 0, -1):
            if rows % d == 0 and d % SUBLANE == 0 and d >= 256 \
                    and step_bytes(d) <= vmem_budget:
                best = d
                break
    return best


def cheb_conv_forward(x_real, x_imag, L_real, L_imag, w_real, w_imag,
                      use_bf16_matmul=False):
    B, N, Cin = x_real.shape
    K1, _, Cout = w_real.shape
    assert L_real.shape == (B, K1, N, N)
    assert L_imag.shape == (B, K1, N, N)

    dtype = x_real.dtype
    itemsize = jnp.dtype(dtype).itemsize
    R = B * N
    kdim = 2 * K1 * Cin
    cout_pad = ((Cout + LANE - 1) // LANE) * LANE

    # ---- Hoisted laplacian reduction (the dominant HBM stream) -------------------
    # bmul only ever needs sum_k L[b,h,n,k]; a single einsum per part emits the
    # reduce + [B,K1,N] -> [B,N,K1] permutation as one fused contraction.
    lr_sum = jnp.einsum('bhnk->bnh', L_real).reshape(R, K1)     # [R, K1]
    li_sum = jnp.einsum('bhnk->bnh', L_imag).reshape(R, K1)

    # ---- Pure-layout packing of the kernel operands (no arithmetic on X) ---------
    # Hop-major column convention: col = h*Cin + c (plus K1*Cin offset for the
    # imag-weight half), matching w_packed's row order below.
    xr = x_real.reshape(R, Cin)
    xi = x_imag.reshape(R, Cin)

    def rep_hops(a):      # [R, K1]  -> [R, K1*Cin]  each hop value repeated Cin times
        return jnp.repeat(a, Cin, axis=-1)

    def tile_hops(x):     # [R, Cin] -> [R, K1*Cin]  X tiled once per hop
        return jnp.tile(x, (1, K1))

    xt = jnp.concatenate([tile_hops(xr), tile_hops(xi)], axis=-1)          # [R, kdim]
    lfr = jnp.concatenate([rep_hops(lr_sum), -rep_hops(li_sum)], axis=-1)  # real rows
    lfi = jnp.concatenate([rep_hops(li_sum), rep_hops(lr_sum)], axis=-1)   # imag rows
    side = jnp.stack([xt, lfr, lfi], axis=0)            # [3, R, kdim] — ONE input stream

    # Hop-major packed weights: row h*Cin + c of the first half = w_real[h, c, :],
    # second half = w_imag[h, c, :].  Lane-dense padding of Cout (zero columns).
    w_packed = jnp.concatenate(
        [w_real.reshape(K1 * Cin, Cout), w_imag.reshape(K1 * Cin, Cout)], axis=0)
    if cout_pad != Cout:
        w_packed = jnp.pad(w_packed, ((0, 0), (0, cout_pad - Cout)))
    matmul_dtype = jnp.bfloat16 if use_bf16_matmul else None
    if matmul_dtype is not None:
        w_packed = w_packed.astype(matmul_dtype)        # cast once, not per grid step

    # ---- Grid / tiling -------------------------------------------------------------
    tm = _pick_row_tile(R, kdim, cout_pad, itemsize=itemsize)
    grid = (R // tm,)

    kernel = functools.partial(_cheb_kernel, matmul_dtype=matmul_dtype)

    flops = 4 * R * kdim * cout_pad                     # two MXU contractions
    bytes_accessed = (side.size * side.dtype.itemsize
                      + w_packed.size * w_packed.dtype.itemsize
                      + 2 * R * cout_pad * itemsize)

    grid_spec = pltpu.PrefetchScalarGridSpec(
        num_scalar_prefetch=0,
        grid=grid,
        in_specs=[
            pl.BlockSpec((3, tm, kdim), lambda r: (0, r, 0)),       # packed side inputs
            pl.BlockSpec((kdim, cout_pad), lambda r: (0, 0)),       # packed weights
        ],
        out_specs=(
            pl.BlockSpec((tm, cout_pad), lambda r: (r, 0)),         # real
            pl.BlockSpec((tm, cout_pad), lambda r: (r, 0)),         # imag
        ),
    )

    out_real, out_imag = pl.pallas_call(
        kernel,
        out_shape=(jax.ShapeDtypeStruct((R, cout_pad), dtype),
                   jax.ShapeDtypeStruct((R, cout_pad), dtype)),
        grid_spec=grid_spec,
        compiler_params=pltpu.CompilerParams(
            dimension_semantics=("parallel",),
            vmem_limit_bytes=32 * 1024 * 1024),
        cost_estimate=pl.CostEstimate(flops=flops, transcendentals=0,
                                      bytes_accessed=bytes_accessed),
    )(side, w_packed)

    out_real = out_real.reshape(B, N, cout_pad)
    out_imag = out_imag.reshape(B, N, cout_pad)
    if cout_pad != Cout:
        out_real = out_real[:, :, :Cout]
        out_imag = out_imag[:, :, :Cout]
    return out_real, out_imag


def cheb_conv_reference(x_real, x_imag, L_real, L_imag, w_real, w_imag):
    """Pure-JAX transcription of the PyTorch forward (use_attention=False)."""
    def bmul(A, X):
        # torch.einsum('bijk,bqjp->bijp', A, X.unsqueeze(1))
        return jnp.einsum('bijk,bqjp->bijp', A, X[:, None])

    real = jnp.matmul(bmul(L_real, x_real), w_real) \
         + jnp.matmul(-1.0 * bmul(L_imag, x_imag), w_imag)
    imag = jnp.matmul(bmul(L_imag, x_real), w_real) \
         + jnp.matmul(bmul(L_real, x_imag), w_imag)
    # torch.stack -> [2, B, K1, N, Cout]; sum over dim=2 (hops)
    return real.sum(axis=1), imag.sum(axis=1)


if __name__ == "__main__":
    # Small shapes: B=2 graphs, N=16 nodes, in_c=8, out_c=32, K=3 (K+1=4 hops).
    B, N, Cin, Cout, K = 2, 16, 8, 32, 3
    K1 = K + 1

    key = jax.random.PRNGKey(0)
    k_xr, k_xi, k_lr, k_li, k_wr, k_wi = jax.random.split(key, 6)

    x_real = jax.random.normal(k_xr, (B, N, Cin), dtype=jnp.float32)
    x_imag = jax.random.normal(k_xi, (B, N, Cin), dtype=jnp.float32)
    L_real = jax.random.normal(k_lr, (B, K1, N, N), dtype=jnp.float32)
    L_imag = jax.random.normal(k_li, (B, K1, N, N), dtype=jnp.float32)

    # Parameter init matching the module: uniform(-stdv, stdv), then each (real, imag)
    # pair normalized to unit complex magnitude.
    stdv = 1.0 / math.sqrt(Cout)
    w_real = jax.random.uniform(k_wr, (K1, Cin, Cout), jnp.float32, -stdv, stdv)
    w_imag = jax.random.uniform(k_wi, (K1, Cin, Cout), jnp.float32, -stdv, stdv)
    magnitude = jnp.sqrt(w_real ** 2 + w_imag ** 2)
    w_real = w_real / magnitude
    w_imag = w_imag / magnitude
    # bias_real / bias_imag exist in the module (zeros) but are unused in forward().

    out_real, out_imag = cheb_conv_forward(x_real, x_imag, L_real, L_imag,
                                           w_real, w_imag)
    jax.block_until_ready((out_real, out_imag))

    ref_real, ref_imag = cheb_conv_reference(x_real, x_imag, L_real, L_imag,
                                             w_real, w_imag)
    assert out_real.shape == ref_real.shape and out_imag.shape == ref_imag.shape
    assert jnp.allclose(out_real, ref_real, atol=1e-4, rtol=1e-4), "real mismatch"
    assert jnp.allclose(out_imag, ref_imag, atol=1e-4, rtol=1e-4), "imag mismatch"

    print("KERNEL_OK")
</pallas_src>

<mosaic_0001>
module attributes {stable_mosaic.version = 11 : i64} {
  func.func @_cheb_kernel(%arg0: i32, %arg1: memref<3x32x64xf32, #tpu.memory_space<vmem>>, %arg2: memref<64x128xf32, #tpu.memory_space<vmem>>, %arg3: memref<32x128xf32, #tpu.memory_space<vmem>>, %arg4: memref<32x128xf32, #tpu.memory_space<vmem>>) attributes {dimension_semantics = [#tpu.dimension_semantics<parallel>], iteration_bounds = array<i64: 1>, scalar_prefetch = 0 : i64, scratch_operands = 0 : i64, tpu.core_type = #tpu.core_type<tc>, window_params = [{transform_indices = @transform_0, window_bounds = array<i64: 3, 32, 64>}, {pipeline_mode = #tpu.pipeline_mode<synchronous>, transform_indices = @transform_1, window_bounds = array<i64: 64, 128>}, {transform_indices = @transform_2, window_bounds = array<i64: 32, 128>}, {transform_indices = @transform_3, window_bounds = array<i64: 32, 128>}]} {
    %c0 = arith.constant 0 : index
    %c0_0 = arith.constant 0 : index
    %c0_1 = arith.constant 0 : index
    %0 = vector.load %arg1[%c0, %c0_0, %c0_1] : memref<3x32x64xf32, #tpu.memory_space<vmem>>, vector<1x32x64xf32>
    %1 = vector.shape_cast %0 : vector<1x32x64xf32> to vector<32x64xf32>
    %c1 = arith.constant 1 : index
    %c0_2 = arith.constant 0 : index
    %c0_3 = arith.constant 0 : index
    %2 = vector.load %arg1[%c1, %c0_2, %c0_3] : memref<3x32x64xf32, #tpu.memory_space<vmem>>, vector<1x32x64xf32>
    %3 = vector.shape_cast %2 : vector<1x32x64xf32> to vector<32x64xf32>
    %c2 = arith.constant 2 : index
    %c0_4 = arith.constant 0 : index
    %c0_5 = arith.constant 0 : index
    %4 = vector.load %arg1[%c2, %c0_4, %c0_5] : memref<3x32x64xf32, #tpu.memory_space<vmem>>, vector<1x32x64xf32>
    %5 = vector.shape_cast %4 : vector<1x32x64xf32> to vector<32x64xf32>
    %6 = arith.mulf %3, %1 : vector<32x64xf32>
    %7 = arith.mulf %5, %1 : vector<32x64xf32>
    %c0_6 = arith.constant 0 : index
    %c0_7 = arith.constant 0 : index
    %8 = vector.load %arg2[%c0_6, %c0_7] : memref<64x128xf32, #tpu.memory_space<vmem>>, vector<64x128xf32>
    %cst = arith.constant dense<0.000000e+00> : vector<32x128xf32>
    %9 = tpu.matmul %6, %8, %cst {dimension_numbers = #tpu.dot_dimension_numbers<[1], [0], [0], [1], [0, 0, 1, 1], [], []>} : vector<32x64xf32>, vector<64x128xf32>, vector<32x128xf32> -> vector<32x128xf32>
    %c0_8 = arith.constant 0 : index
    %c0_9 = arith.constant 0 : index
    %10 = vector.load %arg3[%c0_8, %c0_9] : memref<32x128xf32, #tpu.memory_space<vmem>>, vector<32x128xf32>
    tpu.vector_store %arg3[%c0_8, %c0_9], %9 {strides = array<i32>} : memref<32x128xf32, #tpu.memory_space<vmem>>, vector<32x128xf32>,
    %cst_10 = arith.constant dense<0.000000e+00> : vector<32x128xf32>
    %11 = tpu.matmul %7, %8, %cst_10 {dimension_numbers = #tpu.dot_dimension_numbers<[1], [0], [0], [1], [0, 0, 1, 1], [], []>} : vector<32x64xf32>, vector<64x128xf32>, vector<32x128xf32> -> vector<32x128xf32>
    %c0_11 = arith.constant 0 : index
    %c0_12 = arith.constant 0 : index
    %12 = vector.load %arg4[%c0_11, %c0_12] : memref<32x128xf32, #tpu.memory_space<vmem>>, vector<32x128xf32>
    tpu.vector_store %arg4[%c0_11, %c0_12], %11 {strides = array<i32>} : memref<32x128xf32, #tpu.memory_space<vmem>>, vector<32x128xf32>,
    return
  }
  func.func @transform_0(%arg0: i32) -> (i32, i32, i32) {
    %c0_i32 = arith.constant 0 : i32
    %c0_i32_0 = arith.constant 0 : i32
    %c0_i32_1 = arith.constant 0 : i32
    return %c0_i32, %arg0, %c0_i32_0 : i32, i32, i32
  }
  func.func @transform_1(%arg0: i32) -> (i32, i32) {
    %c0_i32 = arith.constant 0 : i32
    %c0_i32_0 = arith.constant 0 : i32
    %c0_i32_1 = arith.constant 0 : i32
    return %c0_i32, %c0_i32_0 : i32, i32
  }
  func.func @transform_2(%arg0: i32) -> (i32, i32) {
    %c0_i32 = arith.constant 0 : i32
    %c0_i32_0 = arith.constant 0 : i32
    return %arg0, %c0_i32 : i32, i32
  }
  func.func @transform_3(%arg0: i32) -> (i32, i32) {
    %c0_i32 = arith.constant 0 : i32
    %c0_i32_0 = arith.constant 0 : i32
    return %arg0, %c0_i32 : i32, i32
  }
}

</mosaic_0001>

<bundles_post_ra>
// kernel: tpu_custom_call.1
= control target key start
LH: loop header
LB: loop body
LE: loop exit
PB: predicated region body
PF: predicated region fallthrough
CT: control target
= control target key end

     0   :  { %9 = vsyncpa [#allocation3], 0  ;;  %s398_s0 = inlined_call_operand.hbm [shape: f32[3,32,64], index: 0, kind: input, shape index: {}]   ;;  %s399_s1 = inlined_call_operand.hbm [shape: f32[64,128], index: 1, kind: input, shape index: {}]   ;;  %s400_s2 = inlined_call_operand.hbm [shape: f32[32,128], index: 2, kind: output, shape index: {0}]   ;;  %s401_s3 = inlined_call_operand.hbm [shape: f32[32,128], index: 3, kind: output, shape index: {1}]  }
   0x1   :  { %10 = vsyncpa [#allocation6], 0 }
   0x2   :  { %11 = vsyncpa [#allocation4], 0 }
   0x3   :  { %12 = vsyncpa [#allocation9], 0  ;;  %s17_s14 = sshll.u32 %s398_s0, 4  ;;  %s340_s15 = smov [#allocation2]   ;;  %s18_s14 = int_to_ptr.hbm [resolvable:$true] %s17_s14 }
   0x4   :  { %s19_s16 = sshll.u32 %s340_s15, 4  ;;  %s30_s19 = sshll.u32 %s399_s1, 4  ;;  %s20_s16 = int_to_ptr.vmem [resolvable:$true] %s19_s16  ;;  %s31_s19 = int_to_ptr.hbm [resolvable:$true] %s30_s19 }
   0x5   :  { %s341_s20 = smov 128   ;;  %s342_s21 = smov 8  }
   0x6   :  { %25 = dma.hbm_to_vmem [thread:$0]  %s18_s14, 1536, %s20_s16, [#allocation3], %s341_s20, %s341_s20, %s342_s21  }
   0x7   :  { %s343_s22 = smov [#allocation5]  }
   0x8   :  { %s32_s23 = sshll.u32 %s343_s22, 4  ;;  %s33_s23 = int_to_ptr.vmem [resolvable:$true] %s32_s23 }
   0x9   :  { %38 = dma.hbm_to_vmem [thread:$0]  %s31_s19, 1024, %s33_s23, [#allocation6], %s341_s20, %s341_s20, %s342_s21  }
   0xa   :  { %332 = dma.done.wait [#allocation3], 1536  }
   0xb   :  { %333 = vsyncadd [#allocation3], 4294965760 }
   0xc   :  { %334 = dma.done.wait [#allocation6], 1024  }
   0xd   :  { %335 = vsyncadd [#allocation6], 4294966272  ;;  %v76_v0 = vld [vmem:[#allocation5 + $0x38] sm:$0xff]  ;;  %v75_v1 = vld [vmem:[#allocation5 + $0x30] sm:$0xff]  ;;  %vm77_vm0 = vcmask 523264   ;;  %s344_s0 = smov [#allocation7]  }
   0xe   :  { %214 = vmatpush.msra.mxu2 %v76_v0  ;;  %222 = vmatpush.msra.mxu3 %v76_v0  ;;  %v74_v2 = vld [vmem:[#allocation5 + $0x28] sm:$0xff]  ;;  %v73_v3 = vld [vmem:[#allocation5 + $0x20] sm:$0xff]  ;;  %v72_v4 = vld [vmem:[#allocation5 + $0x18] sm:$0xff]  ;;  %s172_s1 = sshll.u32 %s344_s0, 4  ;;  %s174_s26 = sshll.u32 %s400_s2, 4  ;;  %s173_s1 = int_to_ptr.vmem [resolvable:$true] %s172_s1  ;;  %s175_s26 = int_to_ptr.hbm [resolvable:$true] %s174_s26 }
   0xf   :  { %98 = vmatpush.msra.mxu0 %v76_v0  ;;  %143 = vmatpush.msra.mxu1 %v76_v0  ;;  %v71_v5 = vld [vmem:[#allocation5 + $0x10] sm:$0xff]  ;;  %v70_v9 = vld [vmem:[#allocation5 + $0x8] sm:$0xff]  ;;  %v47_v10 = vld [vmem:[#allocation2] sm:$0xff]  ;;  %s345_s27 = smov [#allocation8]   ;;  %s187_s4 = sshll.u32 %s401_s3, 4  ;;  %s188_s4 = int_to_ptr.hbm [resolvable:$true] %s187_s4 }
  0x10   :  { %215 = vmatpush.msra.mxu2 %v75_v1  ;;  %223 = vmatpush.msra.mxu3 %v75_v1  ;;  %v49_v6 = vld [vmem:[#allocation2 + $0x10] sm:$0xff]  ;;  %v52_v11 = vld [vmem:[#allocation2 + $0x20] sm:$0xff]  ;;  %v50_v18 = vld [vmem:[#allocation2 + $0x18] sm:$0xff]  ;;  %s185_s28 = sshll.u32 %s345_s27, 4  ;;  %s186_s28 = int_to_ptr.vmem [resolvable:$true] %s185_s28 }
  0x11   :  { %99 = vmatpush.msra.mxu0 %v75_v1  ;;  %144 = vmatpush.msra.mxu1 %v75_v1  ;;  %v54_v7 = vld [vmem:[#allocation2 + $0x30] sm:$0xff]  ;;  %v57_v12 = vld [vmem:[#allocation2 + $0x40] sm:$0xff]  ;;  %v61_v16 = vmul.f32 %v52_v11, %v47_v10  ;;  %v55_v19 = vld [vmem:[#allocation2 + $0x38] sm:$0xff] }
  0x12   :  { %216 = vmatpush.msra.mxu2 %v74_v2  ;;  %224 = vmatpush.msra.mxu3 %v74_v2  ;;  %v59_v8 = vld [vmem:[#allocation2 + $0x50] sm:$0xff]  ;;  %v69_v13 = vld [vmem:[#allocation5] sm:$0xff]  ;;  %v63_v14 = vmul.f32 %v54_v7, %v49_v6  ;;  %v65_v17 = vmul.f32 %v57_v12, %v47_v10  ;;  %v60_v20 = vld [vmem:[#allocation2 + $0x58] sm:$0xff]  ;;  %v64_v24 = vmul.f32 %v55_v19, %v50_v18 }
  0x13   :  { %100 = vmatpush.msra.mxu0 %v74_v2  ;;  %145 = vmatpush.msra.mxu1 %v74_v2  ;;  %v67_v15 = vmul.f32 %v59_v8, %v49_v6  ;;  %v48_v21 = vld [vmem:[#allocation2 + $0x8] sm:$0xff]  ;;  %v68_v25 = vmul.f32 %v60_v20, %v50_v18 }
  0x14   :  { %217 = vmatpush.msra.mxu2 %v73_v3  ;;  %225 = vmatpush.msra.mxu3 %v73_v3  ;;  %v53_v22 = vld [vmem:[#allocation2 + $0x28] sm:$0xff] }
  0x15   :  { %101 = vmatpush.msra.mxu0 %v73_v3  ;;  %146 = vmatpush.msra.mxu1 %v73_v3  ;;  %v58_v23 = vld [vmem:[#allocation2 + $0x48] sm:$0xff]  ;;  %v62_v26 = vmul.f32 %v53_v22, %v48_v21 }
  0x16   :  { %218 = vmatpush.msra.mxu2 %v72_v4  ;;  %226 = vmatpush.msra.mxu3 %v72_v4  ;;  %v66_v27 = vmul.f32 %v58_v23, %v48_v21 }
  0x17   :  { %102 = vmatpush.msra.mxu0 %v72_v4  ;;  %147 = vmatpush.msra.mxu1 %v72_v4 }
  0x18   :  { %219 = vmatpush.msra.mxu2 %v71_v5  ;;  %227 = vmatpush.msra.mxu3 %v71_v5 }
  0x19   :  { %103 = vmatpush.msra.mxu0 %v71_v5  ;;  %148 = vmatpush.msra.mxu1 %v71_v5 }
  0x1a   :  { %220 = vmatpush.msra.mxu2 %v70_v9  ;;  %228 = vmatpush.msra.mxu3 %v70_v9 }
  0x1b   :  { %104 = vmatpush.msra.mxu0 %v70_v9  ;;  %149 = vmatpush.msra.mxu1 %v70_v9 }
  0x1c   :  { %221 = vmatpush.msra.mxu2 %v69_v13  ;;  %229 = vmatpush.msra.mxu3 %v69_v13 }
  0x1d   :  { %208 = vmatmul.msk.f32.vlgmr.msra.gmra.mxu2 %vm77_vm0, %v63_v14  ;;  %212 = vmatmul.msk.f32.vlgmr.msra.gmra.mxu3 %vm77_vm0, %v67_v15 }
  0x1e   :  { %105 = vmatpush.msra.mxu0 %v69_v13  ;;  %150 = vmatpush.msra.mxu1 %v69_v13 }
  0x1f   :  { %206 = vmatmul.msk.f32.vlgmr.msra.gmra.mxu0 %vm77_vm0, %v61_v16  ;;  %210 = vmatmul.msk.f32.vlgmr.msra.gmra.mxu1 %vm77_vm0, %v65_v17 }
  0x25   :  { %209 = vmatmul.msk.f32.gmra.mxu2 %vm77_vm0, %v64_v24  ;;  %213 = vmatmul.msk.f32.gmra.mxu3 %vm77_vm0, %v68_v25 }
  0x27   :  { %207 = vmatmul.msk.f32.gmra.mxu0 %vm77_vm0, %v62_v26  ;;  %211 = vmatmul.msk.f32.gmra.mxu1 %vm77_vm0, %v66_v27 }
  0x9c   :  { %v107_v28 = vpop.f32.mrf.mxu0  ;;  %v152_v29 = vpop.f32.mrf.mxu1 }
  0x9d   :  { %119 = vst [vmem:[#allocation7] sm:$0xff] %v107_v28 }
  0x9e   :  { %164 = vst [vmem:[#allocation8] sm:$0xff] %v152_v29 }
  0xa0   :  { %v113_v30 = vpop.f32.mrf.mxu2  ;;  %v158_v31 = vpop.f32.mrf.mxu3 }
  0xa1   :  { %121 = vst [vmem:[#allocation7 + $0x10] sm:$0xff] %v113_v30 }
  0xa2   :  { %166 = vst [vmem:[#allocation8 + $0x10] sm:$0xff] %v158_v31 }
  0xa4   :  { %v110_v32 = vpop.f32.mrf.mxu0  ;;  %v155_v33 = vpop.f32.mrf.mxu1 }
  0xa5   :  { %120 = vst [vmem:[#allocation7 + $0x8] sm:$0xff] %v110_v32 }
  0xa6   :  { %165 = vst [vmem:[#allocation8 + $0x8] sm:$0xff] %v155_v33 }
  0xa8   :  { %v116_v34 = vpop.f32.mrf.mxu2  ;;  %v161_v35 = vpop.f32.mrf.mxu3 }
  0xa9   :  { %122 = vst [vmem:[#allocation7 + $0x18] sm:$0xff] %v116_v34 }
  0xaa   :  { %167 = vst [vmem:[#allocation8 + $0x18] sm:$0xff] %v161_v35  ;;  %180 = dma.vmem_to_hbm [thread:$0]  %s173_s1, 512, %s175_s26, [#allocation4], %s341_s20, %s341_s20, %s342_s21  }
  0xab   :  { %193 = dma.vmem_to_hbm [thread:$0]  %s186_s28, 512, %s188_s4, [#allocation9], %s341_s20, %s341_s20, %s342_s21  }
  0xac   :  { %336 = dma.done.wait [#allocation4], 512  }
  0xad   :  { %337 = vsyncadd [#allocation4], 4294966784 }
  0xae   :  { %338 = dma.done.wait [#allocation9], 512  }
  0xaf   :  { %339 = vsyncadd [#allocation9], 4294966784 }
  0xb0   :  { %202 = vsyncpa [#allocation3], 1 }
  0xb1   :  { %203 = vsyncpa [#allocation6], 1 }
  0xb2   :  { %204 = vsyncpa [#allocation4], 1 }
  0xb3   :  { %205 = vsyncpa [#allocation9], 1 }

</bundles_post_ra>
